<compile_context>
chip_gen: v7x
topology: tpu7x:2x2x1
jax: 0.10.0
libtpu: 0.0.40
codegen_flags: <defaults>
</compile_context>

<pallas_src>
import jax
import jax.numpy as jnp
from jax.experimental import pallas as pl
from jax.experimental.pallas import tpu as pltpu

NUM_STAGE = 3        # default num_stage in MonolocoModel
BN_EPS = 1e-5        # PyTorch BatchNorm1d default eps
OUT_PAD = 128        # lane-dense padded output width (real output_size sliced in glue)
MAX_TB = 4096        # per-generation safe tile cap (keeps VMEM well under v7x's 64 MiB)


def _shift_relu(z_f32, shift_f32):
    # z: (tb, L) f32 MXU result; shift: (1, L) f32 (Linear bias + BN fully folded, eval mode)
    return jnp.maximum(z_f32 + shift_f32, 0.0).astype(jnp.bfloat16)


def monoloco_kernel(x_ref, w_in_ref, s_in_ref, wblk_ref, sblk_ref,
                    w_out_ref, b_out_ref, out_ref):
    # Weights arrive bf16 with BN scale pre-folded. Activations are bf16 between layers;
    # the shift-add + ReLU runs in f32 directly on the MXU's f32 accumulator output.
    x = x_ref[...].astype(jnp.bfloat16)
    h = _shift_relu(
        jnp.dot(x, w_in_ref[...], preferred_element_type=jnp.float32),
        s_in_ref[...])
    for i in range(NUM_STAGE):               # MyLinear residual blocks (dropout = id in eval)
        t = _shift_relu(
            jnp.dot(h, wblk_ref[2 * i], preferred_element_type=jnp.float32),
            sblk_ref[2 * i])
        t = _shift_relu(
            jnp.dot(t, wblk_ref[2 * i + 1], preferred_element_type=jnp.float32),
            sblk_ref[2 * i + 1])
        h = h + t                            # residual: out = x + y   (bf16 add)
    # final Linear (no BN / ReLU); lane-dense (tb, 128) bf16 store -> unmasked vst,
    # half the HBM writeback of the previous f32 output.
    out_ref[...] = (jnp.dot(h, w_out_ref[...], preferred_element_type=jnp.float32)
                    + b_out_ref[...]).astype(out_ref.dtype)


def _round_up(n, m):
    return (n + m - 1) // m * m


def _cdiv(a, b):
    return (a + b - 1) // b


def _choose_tiles(B, block_b):
    """Pick (tile_B, padded_B) with an even number of >=2 grid steps when possible."""
    block_b = max(8, min(block_b, MAX_TB))
    B8 = _round_up(max(B, 8), 8)
    if B8 < 16:
        return B8, B8                         # too small to split across 2 TCs
    steps = max(_cdiv(B8, block_b), 2)        # at least 2 steps ...
    steps = _round_up(steps, 2)               # ... and an even count for v7x megacore
    tb = _round_up(_cdiv(B8, steps), 8)       # sublane-aligned tile
    return tb, steps * tb


def monoloco_forward(x, params, output_size=2, block_b=1024):
    """x: (B, input_size) float32; params from make_params(). Returns (B, output_size) f32."""
    w_in, s_in, wblk, sblk, w_out, b_out = params
    B, in_dim = x.shape
    L = w_in.shape[1]

    tb, pB = _choose_tiles(B, block_b)
    if pB != B:
        x = jnp.pad(x, ((0, pB - B), (0, 0)))

    grid = (pB // tb,)
    const2 = lambda i: (0, 0)
    const3 = lambda i: (0, 0, 0)

    # VMEM budget: 2x resident weights (BlockSpec double-buffers even constant maps),
    # double-buffered x/out tiles, and in-kernel intermediates (f32 matmul result,
    # bf16 h & t, f32 pre-store output), with headroom. Stays well under v7x's 64 MiB.
    weight_bytes = sum(int(a.size) * a.dtype.itemsize
                       for a in (w_in, s_in, wblk, sblk, w_out, b_out))
    io_bytes = 2 * (tb * in_dim * 4 + tb * OUT_PAD * 2)
    inter_bytes = tb * L * 4 + 2 * tb * L * 2 + tb * OUT_PAD * 4
    vmem_limit = int(min(48 << 20,
                         max(16 << 20,
                             2 * weight_bytes + io_bytes + 2 * inter_bytes + (4 << 20))))

    flops = 2 * pB * (in_dim * L + 2 * NUM_STAGE * L * L + L * OUT_PAD)
    bytes_accessed = pB * in_dim * 4 + pB * OUT_PAD * 2 + weight_bytes

    out = pl.pallas_call(
        monoloco_kernel,
        out_shape=jax.ShapeDtypeStruct((pB, OUT_PAD), jnp.bfloat16),
        grid=grid,
        in_specs=[
            pl.BlockSpec((tb, in_dim), lambda i: (i, 0)),   # x: per-step batch tile
            pl.BlockSpec(w_in.shape, const2),               # weights/shifts: VMEM-resident
            pl.BlockSpec(s_in.shape, const2),
            pl.BlockSpec(wblk.shape, const3),
            pl.BlockSpec(sblk.shape, const3),
            pl.BlockSpec(w_out.shape, const2),
            pl.BlockSpec(b_out.shape, const2),
        ],
        out_specs=pl.BlockSpec((tb, OUT_PAD), lambda i: (i, 0)),
        compiler_params=pltpu.CompilerParams(
            dimension_semantics=("parallel",),
            vmem_limit_bytes=vmem_limit),
        cost_estimate=pl.CostEstimate(flops=int(flops),
                                      transcendentals=0,
                                      bytes_accessed=int(bytes_accessed)),
    )(x, w_in, s_in, wblk, sblk, w_out, b_out)
    return out[:B, :output_size].astype(jnp.float32)


# ------------- deterministic parameter construction (no checkpoint) -------------

def _linear(key, fan_in, fan_out):
    kw, kb = jax.random.split(key)
    w = jax.random.normal(kw, (fan_in, fan_out), jnp.float32) * (0.5 / jnp.sqrt(fan_in))
    b = 0.1 * jax.random.normal(kb, (fan_out,), jnp.float32)
    return w, b


def _bn(key, dim):
    k1, k2, k3, k4 = jax.random.split(key, 4)
    gamma = 1.0 + 0.1 * jax.random.normal(k1, (dim,), jnp.float32)
    beta = 0.1 * jax.random.normal(k2, (dim,), jnp.float32)
    mean = 0.1 * jax.random.normal(k3, (dim,), jnp.float32)
    var = 1.0 + 0.5 * jax.random.uniform(k4, (dim,), jnp.float32)
    return gamma, beta, mean, var


def _fold_bn_into_linear(w, b, gamma, beta, mean, var):
    """bn(x@W + b) == x @ (W*scale) + shift ; all folding done in f32."""
    scale = gamma / jnp.sqrt(var + BN_EPS)                 # (L,)
    w_folded = w * scale[None, :]                          # column-scaled weight, f32
    shift = ((b - mean) * scale + beta)[None, :]           # (1, L) f32
    return w_folded, shift


def make_params(key, input_size, linear_size, output_size=2):
    L = linear_size
    keys = jax.random.split(key, 4 * NUM_STAGE + 3)

    w_in, b_in = _linear(keys[0], input_size, L)
    w_in, s_in = _fold_bn_into_linear(w_in, b_in, *_bn(keys[1], L))

    wblks, sblks = [], []
    for s in range(2 * NUM_STAGE):
        w, b = _linear(keys[2 + 2 * s], L, L)
        w, sh = _fold_bn_into_linear(w, b, *_bn(keys[3 + 2 * s], L))
        wblks.append(w)
        sblks.append(sh)

    w2, b2 = _linear(keys[-1], L, output_size)             # final Linear: (L, out), (out,)
    w_out = jnp.zeros((L, OUT_PAD), jnp.float32).at[:, :output_size].set(w2)
    b_out = jnp.zeros((1, OUT_PAD), jnp.float32).at[0, :output_size].set(b2)

    # weights in bf16 (MXU-native, halves weight HBM/VMEM); shifts/bias stay f32
    return [w_in.astype(jnp.bfloat16), s_in,
            jnp.stack(wblks, 0).astype(jnp.bfloat16), jnp.stack(sblks, 0),
            w_out.astype(jnp.bfloat16), b_out]


def monoloco_ref(x, params, output_size=2):
    """Pure-JAX f32 reference using the same (bf16-quantized, BN-folded) weights."""
    w_in, s_in, wblk, sblk, w_out, b_out = [jnp.asarray(p, jnp.float32) for p in params]

    def sr(z, sh):
        return jnp.maximum(z + sh, 0.0)

    h = sr(x @ w_in, s_in)
    for i in range(NUM_STAGE):
        t = sr(h @ wblk[2 * i], sblk[2 * i])
        t = sr(t @ wblk[2 * i + 1], sblk[2 * i + 1])
        h = h + t
    y = h @ w_out + b_out
    return y[:, :output_size]


if __name__ == "__main__":
    B = 8
    INPUT_SIZE = 34      # monoloco keypoint input (17 joints x 2)
    LINEAR_SIZE = 256    # MonolocoModel default linear_size
    OUTPUT_SIZE = 2      # MonolocoModel default output_size

    key = jax.random.PRNGKey(0)
    kx, kp = jax.random.split(key)

    x = jax.random.normal(kx, (B, INPUT_SIZE), jnp.float32)
    params = make_params(kp, INPUT_SIZE, LINEAR_SIZE, OUTPUT_SIZE)

    out = monoloco_forward(x, params, output_size=OUTPUT_SIZE)
    out = jax.block_until_ready(out)
    assert out.shape == (B, OUTPUT_SIZE) and out.dtype == jnp.float32

    ref = monoloco_ref(x, params, OUTPUT_SIZE)
    assert jnp.allclose(out, ref, rtol=1e-1, atol=1e-1), float(jnp.max(jnp.abs(out - ref)))
    # TODO(synk): training-mode behaviour (batch-stat BatchNorm, active Dropout) is not
    # modeled; the kernel implements eval-mode forward only.
    print("KERNEL_OK")
</pallas_src>

<mosaic_0001>
module attributes {stable_mosaic.version = 11 : i64} {
  func.func @monoloco_kernel(%arg0: i32, %arg1: memref<8x34xf32, #tpu.memory_space<vmem>>, %arg2: memref<34x256xbf16, #tpu.memory_space<vmem>>, %arg3: memref<1x256xf32, #tpu.memory_space<vmem>>, %arg4: memref<6x256x256xbf16, #tpu.memory_space<vmem>>, %arg5: memref<6x1x256xf32, #tpu.memory_space<vmem>>, %arg6: memref<256x128xbf16, #tpu.memory_space<vmem>>, %arg7: memref<1x128xf32, #tpu.memory_space<vmem>>, %arg8: memref<8x128xbf16, #tpu.memory_space<vmem>>) attributes {dimension_semantics = [#tpu.dimension_semantics<parallel>], iteration_bounds = array<i64: 1>, scalar_prefetch = 0 : i64, scratch_operands = 0 : i64, tpu.core_type = #tpu.core_type<tc>, window_params = [{transform_indices = @transform_0, window_bounds = array<i64: 8, 34>}, {pipeline_mode = #tpu.pipeline_mode<synchronous>, transform_indices = @transform_1, window_bounds = array<i64: 34, 256>}, {pipeline_mode = #tpu.pipeline_mode<synchronous>, transform_indices = @transform_2, window_bounds = array<i64: 1, 256>}, {pipeline_mode = #tpu.pipeline_mode<synchronous>, transform_indices = @transform_3, window_bounds = array<i64: 6, 256, 256>}, {pipeline_mode = #tpu.pipeline_mode<synchronous>, transform_indices = @transform_4, window_bounds = array<i64: 6, 1, 256>}, {pipeline_mode = #tpu.pipeline_mode<synchronous>, transform_indices = @transform_5, window_bounds = array<i64: 256, 128>}, {pipeline_mode = #tpu.pipeline_mode<synchronous>, transform_indices = @transform_6, window_bounds = array<i64: 1, 128>}, {transform_indices = @transform_7, window_bounds = array<i64: 8, 128>}]} {
    %c0 = arith.constant 0 : index
    %c0_0 = arith.constant 0 : index
    %0 = vector.load %arg1[%c0, %c0_0] : memref<8x34xf32, #tpu.memory_space<vmem>>, vector<8x34xf32>
    %1 = arith.truncf %0 : vector<8x34xf32> to vector<8x34xbf16>
    %c0_1 = arith.constant 0 : index
    %c0_2 = arith.constant 0 : index
    %2 = vector.load %arg2[%c0_1, %c0_2] : memref<34x256xbf16, #tpu.memory_space<vmem>>, vector<34x256xbf16>
    %cst = arith.constant dense<0.000000e+00> : vector<8x256xf32>
    %3 = tpu.matmul %1, %2, %cst {dimension_numbers = #tpu.dot_dimension_numbers<[1], [0], [0], [1], [0, 0, 1, 1], [], []>} : vector<8x34xbf16>, vector<34x256xbf16>, vector<8x256xf32> -> vector<8x256xf32>
    %c0_3 = arith.constant 0 : index
    %c0_4 = arith.constant 0 : index
    %4 = vector.load %arg3[%c0_3, %c0_4] : memref<1x256xf32, #tpu.memory_space<vmem>>, vector<1x256xf32>
    %5 = vector.broadcast %4 : vector<1x256xf32> to vector<8x256xf32>
    %6 = arith.addf %3, %5 : vector<8x256xf32>
    %cst_5 = arith.constant 0.000000e+00 : f32
    %7 = vector.broadcast %cst_5 : f32 to vector<8x256xf32>
    %8 = arith.maximumf %6, %7 : vector<8x256xf32>
    %9 = arith.truncf %8 : vector<8x256xf32> to vector<8x256xbf16>
    %c0_6 = arith.constant 0 : index
    %c0_7 = arith.constant 0 : index
    %c0_8 = arith.constant 0 : index
    %10 = vector.load %arg4[%c0_6, %c0_7, %c0_8] : memref<6x256x256xbf16, #tpu.memory_space<vmem>>, vector<1x256x256xbf16>
    %11 = vector.shape_cast %10 : vector<1x256x256xbf16> to vector<256x256xbf16>
    %cst_9 = arith.constant dense<0.000000e+00> : vector<8x256xf32>
    %12 = tpu.matmul %9, %11, %cst_9 {dimension_numbers = #tpu.dot_dimension_numbers<[1], [0], [0], [1], [0, 0, 1, 1], [], []>} : vector<8x256xbf16>, vector<256x256xbf16>, vector<8x256xf32> -> vector<8x256xf32>
    %c0_10 = arith.constant 0 : index
    %c0_11 = arith.constant 0 : index
    %c0_12 = arith.constant 0 : index
    %13 = vector.load %arg5[%c0_10, %c0_11, %c0_12] : memref<6x1x256xf32, #tpu.memory_space<vmem>>, vector<1x1x256xf32>
    %14 = vector.shape_cast %13 : vector<1x1x256xf32> to vector<1x256xf32>
    %15 = vector.broadcast %14 : vector<1x256xf32> to vector<8x256xf32>
    %16 = arith.addf %12, %15 : vector<8x256xf32>
    %cst_13 = arith.constant 0.000000e+00 : f32
    %17 = vector.broadcast %cst_13 : f32 to vector<8x256xf32>
    %18 = arith.maximumf %16, %17 : vector<8x256xf32>
    %19 = arith.truncf %18 : vector<8x256xf32> to vector<8x256xbf16>
    %c1 = arith.constant 1 : index
    %c0_14 = arith.constant 0 : index
    %c0_15 = arith.constant 0 : index
    %20 = vector.load %arg4[%c1, %c0_14, %c0_15] : memref<6x256x256xbf16, #tpu.memory_space<vmem>>, vector<1x256x256xbf16>
    %21 = vector.shape_cast %20 : vector<1x256x256xbf16> to vector<256x256xbf16>
    %cst_16 = arith.constant dense<0.000000e+00> : vector<8x256xf32>
    %22 = tpu.matmul %19, %21, %cst_16 {dimension_numbers = #tpu.dot_dimension_numbers<[1], [0], [0], [1], [0, 0, 1, 1], [], []>} : vector<8x256xbf16>, vector<256x256xbf16>, vector<8x256xf32> -> vector<8x256xf32>
    %c1_17 = arith.constant 1 : index
    %c0_18 = arith.constant 0 : index
    %c0_19 = arith.constant 0 : index
    %23 = vector.load %arg5[%c1_17, %c0_18, %c0_19] : memref<6x1x256xf32, #tpu.memory_space<vmem>>, vector<1x1x256xf32>
    %24 = vector.shape_cast %23 : vector<1x1x256xf32> to vector<1x256xf32>
    %25 = vector.broadcast %24 : vector<1x256xf32> to vector<8x256xf32>
    %26 = arith.addf %22, %25 : vector<8x256xf32>
    %cst_20 = arith.constant 0.000000e+00 : f32
    %27 = vector.broadcast %cst_20 : f32 to vector<8x256xf32>
    %28 = arith.maximumf %26, %27 : vector<8x256xf32>
    %29 = arith.truncf %28 : vector<8x256xf32> to vector<8x256xbf16>
    %30 = arith.addf %9, %29 : vector<8x256xbf16>
    %c2 = arith.constant 2 : index
    %c0_21 = arith.constant 0 : index
    %c0_22 = arith.constant 0 : index
    %31 = vector.load %arg4[%c2, %c0_21, %c0_22] : memref<6x256x256xbf16, #tpu.memory_space<vmem>>, vector<1x256x256xbf16>
    %32 = vector.shape_cast %31 : vector<1x256x256xbf16> to vector<256x256xbf16>
    %cst_23 = arith.constant dense<0.000000e+00> : vector<8x256xf32>
    %33 = tpu.matmul %30, %32, %cst_23 {dimension_numbers = #tpu.dot_dimension_numbers<[1], [0], [0], [1], [0, 0, 1, 1], [], []>} : vector<8x256xbf16>, vector<256x256xbf16>, vector<8x256xf32> -> vector<8x256xf32>
    %c2_24 = arith.constant 2 : index
    %c0_25 = arith.constant 0 : index
    %c0_26 = arith.constant 0 : index
    %34 = vector.load %arg5[%c2_24, %c0_25, %c0_26] : memref<6x1x256xf32, #tpu.memory_space<vmem>>, vector<1x1x256xf32>
    %35 = vector.shape_cast %34 : vector<1x1x256xf32> to vector<1x256xf32>
    %36 = vector.broadcast %35 : vector<1x256xf32> to vector<8x256xf32>
    %37 = arith.addf %33, %36 : vector<8x256xf32>
    %cst_27 = arith.constant 0.000000e+00 : f32
    %38 = vector.broadcast %cst_27 : f32 to vector<8x256xf32>
    %39 = arith.maximumf %37, %38 : vector<8x256xf32>
    %40 = arith.truncf %39 : vector<8x256xf32> to vector<8x256xbf16>
    %c3 = arith.constant 3 : index
    %c0_28 = arith.constant 0 : index
    %c0_29 = arith.constant 0 : index
    %41 = vector.load %arg4[%c3, %c0_28, %c0_29] : memref<6x256x256xbf16, #tpu.memory_space<vmem>>, vector<1x256x256xbf16>
    %42 = vector.shape_cast %41 : vector<1x256x256xbf16> to vector<256x256xbf16>
    %cst_30 = arith.constant dense<0.000000e+00> : vector<8x256xf32>
    %43 = tpu.matmul %40, %42, %cst_30 {dimension_numbers = #tpu.dot_dimension_numbers<[1], [0], [0], [1], [0, 0, 1, 1], [], []>} : vector<8x256xbf16>, vector<256x256xbf16>, vector<8x256xf32> -> vector<8x256xf32>
    %c3_31 = arith.constant 3 : index
    %c0_32 = arith.constant 0 : index
    %c0_33 = arith.constant 0 : index
    %44 = vector.load %arg5[%c3_31, %c0_32, %c0_33] : memref<6x1x256xf32, #tpu.memory_space<vmem>>, vector<1x1x256xf32>
    %45 = vector.shape_cast %44 : vector<1x1x256xf32> to vector<1x256xf32>
    %46 = vector.broadcast %45 : vector<1x256xf32> to vector<8x256xf32>
    %47 = arith.addf %43, %46 : vector<8x256xf32>
    %cst_34 = arith.constant 0.000000e+00 : f32
    %48 = vector.broadcast %cst_34 : f32 to vector<8x256xf32>
    %49 = arith.maximumf %47, %48 : vector<8x256xf32>
    %50 = arith.truncf %49 : vector<8x256xf32> to vector<8x256xbf16>
    %51 = arith.addf %30, %50 : vector<8x256xbf16>
    %c4 = arith.constant 4 : index
    %c0_35 = arith.constant 0 : index
    %c0_36 = arith.constant 0 : index
    %52 = vector.load %arg4[%c4, %c0_35, %c0_36] : memref<6x256x256xbf16, #tpu.memory_space<vmem>>, vector<1x256x256xbf16>
    %53 = vector.shape_cast %52 : vector<1x256x256xbf16> to vector<256x256xbf16>
    %cst_37 = arith.constant dense<0.000000e+00> : vector<8x256xf32>
    %54 = tpu.matmul %51, %53, %cst_37 {dimension_numbers = #tpu.dot_dimension_numbers<[1], [0], [0], [1], [0, 0, 1, 1], [], []>} : vector<8x256xbf16>, vector<256x256xbf16>, vector<8x256xf32> -> vector<8x256xf32>
    %c4_38 = arith.constant 4 : index
    %c0_39 = arith.constant 0 : index
    %c0_40 = arith.constant 0 : index
    %55 = vector.load %arg5[%c4_38, %c0_39, %c0_40] : memref<6x1x256xf32, #tpu.memory_space<vmem>>, vector<1x1x256xf32>
    %56 = vector.shape_cast %55 : vector<1x1x256xf32> to vector<1x256xf32>
    %57 = vector.broadcast %56 : vector<1x256xf32> to vector<8x256xf32>
    %58 = arith.addf %54, %57 : vector<8x256xf32>
    %cst_41 = arith.constant 0.000000e+00 : f32
    %59 = vector.broadcast %cst_41 : f32 to vector<8x256xf32>
    %60 = arith.maximumf %58, %59 : vector<8x256xf32>
    %61 = arith.truncf %60 : vector<8x256xf32> to vector<8x256xbf16>
    %c5 = arith.constant 5 : index
    %c0_42 = arith.constant 0 : index
    %c0_43 = arith.constant 0 : index
    %62 = vector.load %arg4[%c5, %c0_42, %c0_43] : memref<6x256x256xbf16, #tpu.memory_space<vmem>>, vector<1x256x256xbf16>
    %63 = vector.shape_cast %62 : vector<1x256x256xbf16> to vector<256x256xbf16>
    %cst_44 = arith.constant dense<0.000000e+00> : vector<8x256xf32>
    %64 = tpu.matmul %61, %63, %cst_44 {dimension_numbers = #tpu.dot_dimension_numbers<[1], [0], [0], [1], [0, 0, 1, 1], [], []>} : vector<8x256xbf16>, vector<256x256xbf16>, vector<8x256xf32> -> vector<8x256xf32>
    %c5_45 = arith.constant 5 : index
    %c0_46 = arith.constant 0 : index
    %c0_47 = arith.constant 0 : index
    %65 = vector.load %arg5[%c5_45, %c0_46, %c0_47] : memref<6x1x256xf32, #tpu.memory_space<vmem>>, vector<1x1x256xf32>
    %66 = vector.shape_cast %65 : vector<1x1x256xf32> to vector<1x256xf32>
    %67 = vector.broadcast %66 : vector<1x256xf32> to vector<8x256xf32>
    %68 = arith.addf %64, %67 : vector<8x256xf32>
    %cst_48 = arith.constant 0.000000e+00 : f32
    %69 = vector.broadcast %cst_48 : f32 to vector<8x256xf32>
    %70 = arith.maximumf %68, %69 : vector<8x256xf32>
    %71 = arith.truncf %70 : vector<8x256xf32> to vector<8x256xbf16>
    %72 = arith.addf %51, %71 : vector<8x256xbf16>
    %c0_49 = arith.constant 0 : index
    %c0_50 = arith.constant 0 : index
    %73 = vector.load %arg6[%c0_49, %c0_50] : memref<256x128xbf16, #tpu.memory_space<vmem>>, vector<256x128xbf16>
    %cst_51 = arith.constant dense<0.000000e+00> : vector<8x128xf32>
    %74 = tpu.matmul %72, %73, %cst_51 {dimension_numbers = #tpu.dot_dimension_numbers<[1], [0], [0], [1], [0, 0, 1, 1], [], []>} : vector<8x256xbf16>, vector<256x128xbf16>, vector<8x128xf32> -> vector<8x128xf32>
    %c0_52 = arith.constant 0 : index
    %c0_53 = arith.constant 0 : index
    %75 = vector.load %arg7[%c0_52, %c0_53] : memref<1x128xf32, #tpu.memory_space<vmem>>, vector<1x128xf32>
    %76 = vector.broadcast %75 : vector<1x128xf32> to vector<8x128xf32>
    %77 = arith.addf %74, %76 : vector<8x128xf32>
    %78 = arith.truncf %77 : vector<8x128xf32> to vector<8x128xbf16>
    %c0_54 = arith.constant 0 : index
    %c0_55 = arith.constant 0 : index
    %79 = vector.load %arg8[%c0_54, %c0_55] : memref<8x128xbf16, #tpu.memory_space<vmem>>, vector<8x128xbf16>
    tpu.vector_store %arg8[%c0_54, %c0_55], %78 {strides = array<i32>} : memref<8x128xbf16, #tpu.memory_space<vmem>>, vector<8x128xbf16>,
    return
  }
  func.func @transform_0(%arg0: i32) -> (i32, i32) {
    %c0_i32 = arith.constant 0 : i32
    %c0_i32_0 = arith.constant 0 : i32
    return %arg0, %c0_i32 : i32, i32
  }
  func.func @transform_1(%arg0: i32) -> (i32, i32) {
    %c0_i32 = arith.constant 0 : i32
    %c0_i32_0 = arith.constant 0 : i32
    %c0_i32_1 = arith.constant 0 : i32
    return %c0_i32, %c0_i32_0 : i32, i32
  }
  func.func @transform_2(%arg0: i32) -> (i32, i32) {
    %c0_i32 = arith.constant 0 : i32
    %c0_i32_0 = arith.constant 0 : i32
    %c0_i32_1 = arith.constant 0 : i32
    return %c0_i32, %c0_i32_0 : i32, i32
  }
  func.func @transform_3(%arg0: i32) -> (i32, i32, i32) {
    %c0_i32 = arith.constant 0 : i32
    %c0_i32_0 = arith.constant 0 : i32
    %c0_i32_1 = arith.constant 0 : i32
    %c0_i32_2 = arith.constant 0 : i32
    return %c0_i32, %c0_i32_0, %c0_i32_1 : i32, i32, i32
  }
  func.func @transform_4(%arg0: i32) -> (i32, i32, i32) {
    %c0_i32 = arith.constant 0 : i32
    %c0_i32_0 = arith.constant 0 : i32
    %c0_i32_1 = arith.constant 0 : i32
    %c0_i32_2 = arith.constant 0 : i32
    return %c0_i32, %c0_i32_0, %c0_i32_1 : i32, i32, i32
  }
  func.func @transform_5(%arg0: i32) -> (i32, i32) {
    %c0_i32 = arith.constant 0 : i32
    %c0_i32_0 = arith.constant 0 : i32
    %c0_i32_1 = arith.constant 0 : i32
    return %c0_i32, %c0_i32_0 : i32, i32
  }
  func.func @transform_6(%arg0: i32) -> (i32, i32) {
    %c0_i32 = arith.constant 0 : i32
    %c0_i32_0 = arith.constant 0 : i32
    %c0_i32_1 = arith.constant 0 : i32
    return %c0_i32, %c0_i32_0 : i32, i32
  }
  func.func @transform_7(%arg0: i32) -> (i32, i32) {
    %c0_i32 = arith.constant 0 : i32
    %c0_i32_0 = arith.constant 0 : i32
    return %arg0, %c0_i32 : i32, i32
  }
}

</mosaic_0001>

<bundles_post_ra>
// kernel: tpu_custom_call.1
= control target key start
LH: loop header
LB: loop body
LE: loop exit
PB: predicated region body
PF: predicated region fallthrough
CT: control target
= control target key end

     0   :  { %12 = vsyncpa [#allocation3], 0  ;;  %s2751_s0 = inlined_call_operand.hbm [shape: f32[8,34], index: 0, kind: input, shape index: {}]   ;;  %s2752_s1 = inlined_call_operand.hbm [shape: bf16[34,256], index: 1, kind: input, shape index: {}]   ;;  %s2753_s2 = inlined_call_operand.vmem [shape: f32[1,256], index: 2, kind: input, shape index: {}]   ;;  %s2754_s3 = inlined_call_operand.hbm [shape: bf16[6,256,256], index: 3, kind: input, shape index: {}]   ;;  %s2755_s4 = inlined_call_operand.vmem [shape: f32[6,1,256], index: 4, kind: input, shape index: {}]   ;;  %s2756_s5 = inlined_call_operand.hbm [shape: bf16[256,128], index: 5, kind: input, shape index: {}]   ;;  %s2757_s6 = inlined_call_operand.vmem [shape: f32[1,128], index: 6, kind: input, shape index: {}]   ;;  %s2758_s7 = inlined_call_operand.hbm [shape: bf16[8,128], index: 7, kind: output, shape index: {}]  }
   0x1   :  { %13 = vsyncpa [#allocation6], 0 }
   0x2   :  { %14 = vsyncpa [#allocation9], 0 }
   0x3   :  { %15 = vsyncpa [#allocation4], 0  ;;  %s2569_s24 = smov [#allocation5]   ;;  %s2451_s28 = scalar_lea.hbm %s2752_s1, 640 }
   0x4   :  { %s31_s25 = sshll.u32 %s2569_s24, 4  ;;  %p2452_p0 = scmp.ne.s32.totalorder %s2752_s1, %s2451_s28  ;;  %s32_s25 = int_to_ptr.vmem [resolvable:$true] %s31_s25 }
   0x5   :  { %p2455_p1 = scmp.lt.u32.totalorder %s2451_s28, %s2752_s1 }
   0x7   :  { %p2457_p2 = pnand %p2455_p1, %p2452_p0 }
   0x9   :  { %2460 = shalt.err (!%p2457_p2)
}
   0xa   :  { %s2461_s10 = scalar_lea.vmem %s32_s25, 640  ;;  %p2466_p4 = scmp.lt.s32.totalorder %s32_s25, %s32_s25 }
   0xb   :  { %p2462_p3 = scmp.ne.s32.totalorder %s32_s25, %s2461_s10  ;;  %p2467_p5 = scmp.lt.s32.totalorder %s2461_s10, %s2461_s10 }
   0xd   :  { %p2468_p6 = por %p2467_p5, %p2466_p4 }
   0xf   :  { %p2469_p7 = pnand %p2468_p6, %p2462_p3 }
  0x11   :  { %2472 = shalt.err (!%p2469_p7)
}
  0x12   :  { %s2570_s11 = smov 128   ;;  %s2571_s12 = smov 8  }
  0x13   :  { %37 = dma.hbm_to_vmem [thread:$0]  %s2752_s1, 640, %s32_s25, [#allocation6], %s2570_s11, %s2570_s11, %s2571_s12  }
  0x14   :  { %s2572_s15 = smov [#allocation2]   ;;  %s2573_s17 = smov [#allocation7]  }
  0x15   :  { %s22_s16 = sshll.u32 %s2572_s15, 4  ;;  %s45_s18 = sshll.u32 %s2573_s17, 4  ;;  %s23_s16 = int_to_ptr.vmem [resolvable:$true] %s22_s16  ;;  %s46_s18 = int_to_ptr.vmem [resolvable:$true] %s45_s18 }
  0x16   :  { %s2473_s21 = scalar_lea.hbm %s2751_s0, 128 }
  0x17   :  { %p2474_p8 = scmp.ne.s32.totalorder %s2751_s0, %s2473_s21  ;;  %p2477_p9 = scmp.lt.u32.totalorder %s2473_s21, %s2751_s0 }
  0x19   :  { %p2479_p10 = pnand %p2477_p9, %p2474_p8 }
  0x1b   :  { %2482 = shalt.err (!%p2479_p10)
}
  0x1c   :  { %s2483_s1 = scalar_lea.vmem %s23_s16, 128  ;;  %p2488_p12 = scmp.lt.s32.totalorder %s23_s16, %s23_s16 }
  0x1d   :  { %p2484_p11 = scmp.ne.s32.totalorder %s23_s16, %s2483_s1  ;;  %p2489_p13 = scmp.lt.s32.totalorder %s2483_s1, %s2483_s1 }
  0x1f   :  { %p2490_p0 = por %p2489_p13, %p2488_p12 }
  0x21   :  { %p2491_p1 = pnand %p2490_p0, %p2484_p11 }
  0x23   :  { %2494 = shalt.err (!%p2491_p1)
}
  0x24   :  { %25 = dma.hbm_to_vmem [thread:$0]  %s2751_s0, 128, %s23_s16, [#allocation3]  }
  0x25   :  { %s2495_s30 = scalar_lea.hbm %s2754_s3, 24576 }
  0x26   :  { %p2496_p2 = scmp.ne.s32.totalorder %s2754_s3, %s2495_s30  ;;  %p2499_p3 = scmp.lt.u32.totalorder %s2495_s30, %s2754_s3 }
  0x28   :  { %p2501_p4 = pnand %p2499_p3, %p2496_p2 }
  0x2a   :  { %2504 = shalt.err (!%p2501_p4)
}
  0x2b   :  { %s2505_s14 = scalar_lea.vmem %s46_s18, 24576  ;;  %p2510_p6 = scmp.lt.s32.totalorder %s46_s18, %s46_s18 }
  0x2c   :  { %p2506_p5 = scmp.ne.s32.totalorder %s46_s18, %s2505_s14  ;;  %p2511_p7 = scmp.lt.s32.totalorder %s2505_s14, %s2505_s14 }
  0x2e   :  { %p2512_p8 = por %p2511_p7, %p2510_p6 }
  0x30   :  { %p2513_p9 = pnand %p2512_p8, %p2506_p5 }
  0x32   :  { %2516 = shalt.err (!%p2513_p9)
}
  0x33   :  { %51 = dma.hbm_to_vmem [thread:$0]  %s2754_s3, 24576, %s46_s18, [#allocation6], %s2570_s11, %s2570_s11, %s2571_s12  }
  0x34   :  { %s2574_s16 = smov [#allocation8]   ;;  %s2517_s21 = scalar_lea.hbm %s2756_s5, 2048 }
  0x35   :  { %s59_s17 = sshll.u32 %s2574_s16, 4  ;;  %p2518_p10 = scmp.ne.s32.totalorder %s2756_s5, %s2517_s21  ;;  %s60_s17 = int_to_ptr.vmem [resolvable:$true] %s59_s17 }
  0x36   :  { %p2521_p11 = scmp.lt.u32.totalorder %s2517_s21, %s2756_s5 }
  0x38   :  { %p2523_p12 = pnand %p2521_p11, %p2518_p10 }
  0x3a   :  { %2526 = shalt.err (!%p2523_p12)
}
  0x3b   :  { %s2527_s1 = scalar_lea.vmem %s60_s17, 2048  ;;  %p2532_p0 = scmp.lt.s32.totalorder %s60_s17, %s60_s17 }
  0x3c   :  { %p2528_p13 = scmp.ne.s32.totalorder %s60_s17, %s2527_s1  ;;  %p2533_p1 = scmp.lt.s32.totalorder %s2527_s1, %s2527_s1 }
  0x3e   :  { %p2534_p2 = por %p2533_p1, %p2532_p0 }
  0x40   :  { %p2535_p3 = pnand %p2534_p2, %p2528_p13 }
  0x42   :  { %2538 = shalt.err (!%p2535_p3)
}
  0x43   :  { %s2575_s3 = smov 64   ;;  %s2576_s11 = smov 4  }
  0x44   :  { %65 = dma.hbm_to_vmem [thread:$0]  %s2756_s5, 2048, %s60_s17, [#allocation9], %s2575_s3, %s2575_s3, %s2576_s11  }
  0x45   :  { %2561 = dma.done.wait [#allocation3], 128  }
  0x46   :  { %2562 = vsyncadd [#allocation3], 4294967168 }
  0x47   :  { %2563 = dma.done.wait [#allocation6], 25216  }
  0x48   :  { %2564 = vsyncadd [#allocation6], 4294942080 }
  0x49   :  { %2565 = dma.done.wait [#allocation9], 2048  }
  0x4a   :  { %2566 = vsyncadd [#allocation9], 4294965248  ;;  %v2577_v0 = vmov 0   ;;  %v2139_v1 = vld [vmem:[#allocation5 + $0x4] ss:$8 sps:$4 sm:$0xff]   ;;  %vm129_vm0 = vcmask 1040384  }
  0x4b   :  { %168 = vmatprep.mubr.bf16.mxu0 %v2577_v0  ;;  %v2141_v2 = vld [vmem:[#allocation5] ss:$8 sps:$4 sm:$0xff]   ;;  %136 = vmatprep.subr.bf16.mxu0 %v2139_v1  ;;  %v2142_v3 = vld [vmem:[#allocation5 + $0x14] ss:$8 sps:$4 sm:$0xff]   ;;  %v2144_v5 = vld [vmem:[#allocation5 + $0x10] ss:$8 sps:$4 sm:$0xff]  }
  0x4c   :  { %v87_v4 = vld [vmem:[#allocation5 + $0x20] sm:$0x11]  ;;  %137 = vmatpush1.bf16.msra.mxu0 %v2141_v2  ;;  %v2147_v8 = vld [vmem:[#allocation7 + $0x4] ss:$8 sps:$4 sm:$0xff]   ;;  %v2149_v9 = vld [vmem:[#allocation7] ss:$8 sps:$4 sm:$0xff]  }
  0x4d   :  { %138 = vmatprep.subr.bf16.mxu0 %v2142_v3  ;;  %v1890_v6 = vcombine.high %v87_v4, %v87_v4  ;;  %v1889_v7 = vcombine.low %v87_v4, %v87_v4  ;;  %v2150_v10 = vld [vmem:[#allocation7 + $0x14] ss:$8 sps:$4 sm:$0xff]   ;;  %385 = vmatprep.subr.bf16.mxu1 %v2147_v8  ;;  %v2152_v12 = vld [vmem:[#allocation7 + $0x10] ss:$8 sps:$4 sm:$0xff]   ;;  %v2153_v14 = vld [vmem:[#allocation7 + $0x24] ss:$8 sps:$4 sm:$0xff]  }
  0x4e   :  { %v81_v11 = vld [vmem:[#allocation2] sm:$0xff]  ;;  %386 = vmatpush1.bf16.msra.mxu1 %v2149_v9  ;;  %vm125_vm1 = vcmask 277504   ;;  %v2155_v16 = vld [vmem:[#allocation7 + $0x20] ss:$8 sps:$4 sm:$0xff]   ;;  %v2159_v19 = vld [vmem:[#allocation7 + $0x44] ss:$8 sps:$4 sm:$0xff]  }
  0x4f   :  { %v131_v13 = vsel %vm129_vm0, %v1889_v7, 0  ;;  %387 = vmatprep.subr.bf16.mxu1 %v2150_v10  ;;  %v82_v15 = vpack.c.bf16 %v81_v11, %v81_v11  ;;  %v2156_v17 = vld [vmem:[#allocation7 + $0x34] ss:$8 sps:$4 sm:$0xff]   ;;  %v2158_v18 = vld [vmem:[#allocation7 + $0x30] ss:$8 sps:$4 sm:$0xff]   ;;  %v90_v7 = vlaneseq  ;;  %s2578_s17 = smov [#allocation10]  }
  0x50   :  { %139 = vmatpush1.bf16.msra.mxu0 %v2144_v5  ;;  %v2161_v20 = vld [vmem:[#allocation7 + $0x40] ss:$8 sps:$4 sm:$0xff]   ;;  %v2162_v21 = vld [vmem:[#allocation7 + $0x54] ss:$8 sps:$4 sm:$0xff]   ;;  %v2164_v22 = vld [vmem:[#allocation7 + $0x50] ss:$8 sps:$4 sm:$0xff]  }
  0x51   :  { %1891 = vmatprep.subr.msk.bf16.mxu0 %vm129_vm0, %v1890_v6  ;;  %v2165_v23 = vld [vmem:[#allocation7 + $0x64] ss:$8 sps:$4 sm:$0xff]   ;;  %v2167_v24 = vld [vmem:[#allocation7 + $0x60] ss:$8 sps:$4 sm:$0xff]   ;;  %v2168_v25 = vld [vmem:[#allocation7 + $0x74] ss:$8 sps:$4 sm:$0xff]  }
  0x52   :  { %388 = vmatpush1.bf16.msra.mxu1 %v2152_v12  ;;  %v2170_v26 = vld [vmem:[#allocation7 + $0x70] ss:$8 sps:$4 sm:$0xff]   ;;  %v2171_v27 = vld [vmem:[#allocation7 + $0x84] ss:$8 sps:$4 sm:$0xff]   ;;  %v2173_v28 = vld [vmem:[#allocation7 + $0x80] ss:$8 sps:$4 sm:$0xff]  }
  0x53   :  { %389 = vmatprep.subr.bf16.mxu1 %v2153_v14  ;;  %v2174_v29 = vld [vmem:[#allocation7 + $0x94] ss:$8 sps:$4 sm:$0xff]   ;;  %v2176_v30 = vld [vmem:[#allocation7 + $0x90] ss:$8 sps:$4 sm:$0xff]   ;;  %v2177_v31 = vld [vmem:[#allocation7 + $0xa4] ss:$8 sps:$4 sm:$0xff]  }
  0x54   :  { %141 = vmatpush1.bf16.msra.mxu0 %v131_v13  ;;  %v2179_v32 = vld [vmem:[#allocation7 + $0xa0] ss:$8 sps:$4 sm:$0xff]   ;;  %v2180_v33 = vld [vmem:[#allocation7 + $0xb4] ss:$8 sps:$4 sm:$0xff]   ;;  %v2182_v34 = vld [vmem:[#allocation7 + $0xb0] ss:$8 sps:$4 sm:$0xff]  }
  0x55   :  { %v2183_v35 = vld [vmem:[#allocation7 + $0xc4] ss:$8 sps:$4 sm:$0xff]   ;;  %v2185_v36 = vld [vmem:[#allocation7 + $0xc0] ss:$8 sps:$4 sm:$0xff]   ;;  %v2186_v37 = vld [vmem:[#allocation7 + $0xd4] ss:$8 sps:$4 sm:$0xff]  }
  0x56   :  { %390 = vmatpush1.bf16.msra.mxu1 %v2155_v16  ;;  %v2188_v38 = vld [vmem:[#allocation7 + $0xd0] ss:$8 sps:$4 sm:$0xff]   ;;  %v2189_v39 = vld [vmem:[#allocation7 + $0xe4] ss:$8 sps:$4 sm:$0xff]   ;;  %v2191_v40 = vld [vmem:[#allocation7 + $0xe0] ss:$8 sps:$4 sm:$0xff]  }
  0x57   :  { %1892 = vmatmul.mubr.msk.bf16.vlgmr.msra.gmra.mrb[0].mxu0 %vm125_vm1, %v82_v15  ;;  %391 = vmatprep.subr.bf16.mxu1 %v2156_v17  ;;  %v2192_v41 = vld [vmem:[#allocation7 + $0xf4] ss:$8 sps:$4 sm:$0xff]   ;;  %v2194_v42 = vld [vmem:[#allocation7 + $0xf0] ss:$8 sps:$4 sm:$0xff]   ;;  %v2195_v43 = vld [vmem:[#allocation7 + $0x100] ss:$8 sps:$4 sm:$0xff]  }
  0x58   :  { %v2197_v44 = vld [vmem:[#allocation7 + $0x104] ss:$8 sps:$4 sm:$0xff]   ;;  %v2200_v45 = vld [vmem:[#allocation7 + $0x114] ss:$8 sps:$4 sm:$0xff]   ;;  %v2198_v46 = vld [vmem:[#allocation7 + $0x110] ss:$8 sps:$4 sm:$0xff]  }
  0x59   :  { %636 = vmatprep.subr.bf16.mxu0 %v2197_v44  ;;  %v2203_v47 = vld [vmem:[#allocation7 + $0x124] ss:$8 sps:$4 sm:$0xff]   ;;  %v2201_v48 = vld [vmem:[#allocation7 + $0x120] ss:$8 sps:$4 sm:$0xff]   ;;  %v2206_v49 = vld [vmem:[#allocation7 + $0x134] ss:$8 sps:$4 sm:$0xff]  }
  0x5a   :  { %392 = vmatpush1.bf16.msra.mxu1 %v2158_v18  ;;  %637 = vmatpush1.bf16.msra.mxu0 %v2195_v43  ;;  %v2204_v50 = vld [vmem:[#allocation7 + $0x130] ss:$8 sps:$4 sm:$0xff]   ;;  %v2209_v51 = vld [vmem:[#allocation7 + $0x144] ss:$8 sps:$4 sm:$0xff]   ;;  %v2207_v52 = vld [vmem:[#allocation7 + $0x140] ss:$8 sps:$4 sm:$0xff]  }
  0x5b   :  { %393 = vmatprep.subr.bf16.mxu1 %v2159_v19  ;;  %638 = vmatprep.subr.bf16.mxu0 %v2200_v45  ;;  %v2212_v53 = vld [vmem:[#allocation7 + $0x154] ss:$8 sps:$4 sm:$0xff]   ;;  %v2210_v54 = vld [vmem:[#allocation7 + $0x150] ss:$8 sps:$4 sm:$0xff]   ;;  %v2215_v55 = vld [vmem:[#allocation7 + $0x164] ss:$8 sps:$4 sm:$0xff]  }
  0x5c   :  { %v2213_v56 = vld [vmem:[#allocation7 + $0x160] ss:$8 sps:$4 sm:$0xff]   ;;  %v2218_v57 = vld [vmem:[#allocation7 + $0x174] ss:$8 sps:$4 sm:$0xff]   ;;  %v2216_v58 = vld [vmem:[#allocation7 + $0x170] ss:$8 sps:$4 sm:$0xff]  }
  0x5d   :  { %v2221_v59 = vld [vmem:[#allocation7 + $0x184] ss:$8 sps:$4 sm:$0xff]   ;;  %v2219_v60 = vld [vmem:[#allocation7 + $0x180] ss:$8 sps:$4 sm:$0xff]   ;;  %v2224_v61 = vld [vmem:[#allocation7 + $0x194] ss:$8 sps:$4 sm:$0xff]  }
  0x5e   :  { %394 = vmatpush1.bf16.msra.mxu1 %v2161_v20  ;;  %639 = vmatpush1.bf16.msra.mxu0 %v2198_v46  ;;  %v2222_v62 = vld [vmem:[#allocation7 + $0x190] ss:$8 sps:$4 sm:$0xff]   ;;  %v2227_v63 = vld [vmem:[#allocation7 + $0x1a4] ss:$8 sps:$4 sm:$0xff]   ;;  %v2225_v0 = vld [vmem:[#allocation7 + $0x1a0] ss:$8 sps:$4 sm:$0xff]  }
  0x5f   :  { %395 = vmatprep.subr.bf16.mxu1 %v2162_v21  ;;  %640 = vmatprep.subr.bf16.mxu0 %v2203_v47  ;;  %v2230_v1 = vld [vmem:[#allocation7 + $0x1b4] ss:$8 sps:$4 sm:$0xff]   ;;  %v2228_v2 = vld [vmem:[#allocation7 + $0x1b0] ss:$8 sps:$4 sm:$0xff]   ;;  %v2233_v3 = vld [vmem:[#allocation7 + $0x1c4] ss:$8 sps:$4 sm:$0xff]  }
  0x60   :  { %v2231_v4 = vld [vmem:[#allocation7 + $0x1c0] ss:$8 sps:$4 sm:$0xff]   ;;  %v2236_v5 = vld [vmem:[#allocation7 + $0x1d4] ss:$8 sps:$4 sm:$0xff]   ;;  %v2234_v6 = vld [vmem:[#allocation7 + $0x1d0] ss:$8 sps:$4 sm:$0xff]  }
  0x61   :  { %v91_v8 = vshrl.u32 %v90_v7, 7  ;;  %v88_v10 = vld [vmem:[%s2753_s2] sm:$0x3]  ;;  %v2264_v43 = vld [vmem:[#allocation7 + $0x270] ss:$8 sps:$4 sm:$0xff]   ;;  %s1874_s19 = sshll.u32 %s2578_s17, 4  ;;  %s1875_s19 = int_to_ptr.vmem [resolvable:$true] %s1874_s19 }
  0x62   :  { %396 = vmatpush1.bf16.msra.mxu1 %v2164_v22  ;;  %641 = vmatpush1.bf16.msra.mxu0 %v2201_v48  ;;  %v2269_v44 = vld [vmem:[#allocation7 + $0x284] ss:$8 sps:$4 sm:$0xff]   ;;  %v2267_v45 = vld [vmem:[#allocation7 + $0x280] ss:$8 sps:$4 sm:$0xff]   ;;  %v2272_v46 = vld [vmem:[#allocation7 + $0x294] ss:$8 sps:$4 sm:$0xff]   ;;  %p2544_p5 = scmp.lt.s32.totalorder %s1875_s19, %s1875_s19 }
  0x63   :  { %397 = vmatprep.subr.bf16.mxu1 %v2165_v23  ;;  %642 = vmatprep.subr.bf16.mxu0 %v2206_v49  ;;  %v2673_v9 = vsub.s32 0, %v91_v8  ;;  %v2678_v11 = vsub.s32 1, %v91_v8  ;;  %v2270_v47 = vld [vmem:[#allocation7 + $0x290] ss:$8 sps:$4 sm:$0xff]   ;;  %v2275_v48 = vld [vmem:[#allocation7 + $0x2a4] ss:$8 sps:$4 sm:$0xff]  }
  0x64   :  { %v2273_v49 = vld [vmem:[#allocation7 + $0x2a0] ss:$8 sps:$4 sm:$0xff]   ;;  %v2290_v7 = vld [vmem:[#allocation7 + $0x2f4] ss:$8 sps:$4 sm:$0xff]   ;;  %v2288_v8 = vld [vmem:[#allocation7 + $0x2f0] ss:$8 sps:$4 sm:$0xff]  }
  0x65   :  { %v93_v12 = vrot.slane %v88_v10, %v2673_v9  ;;  %v97_v13 = vrot.slane %v88_v10, %v2678_v11  ;;  %v2291_v10 = vld [vmem:[#allocation7 + $0x300] ss:$8 sps:$4 sm:$0xff]   ;;  %s2539_s20 = scalar_lea.vmem %s1875_s19, 64 }
  0x66   :  { %398 = vmatpush1.bf16.msra.mxu1 %v2167_v24  ;;  %643 = vmatpush1.bf16.msra.mxu0 %v2204_v50  ;;  %v2239_v24 = vld [vmem:[#allocation7 + $0x1e4] ss:$8 sps:$4 sm:$0xff]   ;;  %v2278_v50 = vld [vmem:[#allocation7 + $0x2b4] ss:$8 sps:$4 sm:$0xff]   ;;  %p2540_p4 = scmp.ne.s32.totalorder %s1875_s19, %s2539_s20  ;;  %p2545_p6 = scmp.lt.s32.totalorder %s2539_s20, %s2539_s20 }
  0x67   :  { %399 = vmatprep.subr.bf16.mxu1 %v2168_v25  ;;  %644 = vmatprep.subr.bf16.mxu0 %v2209_v51  ;;  %v2237_v25 = vld [vmem:[#allocation7 + $0x1e0] ss:$8 sps:$4 sm:$0xff]   ;;  %v2276_v51 = vld [vmem:[#allocation7 + $0x2b0] ss:$8 sps:$4 sm:$0xff]  }
  0x68   :  { %p2546_p7 = por %p2545_p6, %p2544_p5 }
  0x6a   :  { %400 = vmatpush1.bf16.msra.mxu1 %v2170_v26  ;;  %645 = vmatpush1.bf16.msra.mxu0 %v2207_v52  ;;  %v2242_v26 = vld [vmem:[#allocation7 + $0x1f4] ss:$8 sps:$4 sm:$0xff]   ;;  %v2281_v52 = vld [vmem:[#allocation7 + $0x2c4] ss:$8 sps:$4 sm:$0xff]   ;;  %p2547_p8 = pnand %p2546_p7, %p2540_p4 }
  0x6b   :  { %401 = vmatprep.subr.bf16.mxu1 %v2171_v27  ;;  %646 = vmatprep.subr.bf16.mxu0 %v2212_v53  ;;  %v2240_v27 = vld [vmem:[#allocation7 + $0x1f0] ss:$8 sps:$4 sm:$0xff]   ;;  %v2279_v53 = vld [vmem:[#allocation7 + $0x2c0] ss:$8 sps:$4 sm:$0xff]  }
  0x6e   :  { %402 = vmatpush1.bf16.msra.mxu1 %v2173_v28  ;;  %647 = vmatpush1.bf16.msra.mxu0 %v2210_v54  ;;  %v2243_v28 = vld [vmem:[#allocation7 + $0x200] ss:$8 sps:$4 sm:$0xff]   ;;  %v2284_v54 = vld [vmem:[#allocation7 + $0x2d4] ss:$8 sps:$4 sm:$0xff]  }
  0x6f   :  { %403 = vmatprep.subr.bf16.mxu1 %v2174_v29  ;;  %648 = vmatprep.subr.bf16.mxu0 %v2215_v55  ;;  %v2245_v29 = vld [vmem:[#allocation7 + $0x204] ss:$8 sps:$4 sm:$0xff]   ;;  %v2282_v55 = vld [vmem:[#allocation7 + $0x2d0] ss:$8 sps:$4 sm:$0xff]  }
  0x72   :  { %404 = vmatpush1.bf16.msra.mxu1 %v2176_v30  ;;  %649 = vmatpush1.bf16.msra.mxu0 %v2213_v56  ;;  %v2248_v30 = vld [vmem:[#allocation7 + $0x214] ss:$8 sps:$4 sm:$0xff]   ;;  %v213_v56 = vld [vmem:[%s2755_s4] sm:$0x3] }
  0x73   :  { %405 = vmatprep.subr.bf16.mxu1 %v2177_v31  ;;  %650 = vmatprep.subr.bf16.mxu0 %v2218_v57  ;;  %v2246_v31 = vld [vmem:[#allocation7 + $0x210] ss:$8 sps:$4 sm:$0xff]   ;;  %v218_v57 = vrot.slane %v213_v56, %v2673_v9 }
  0x76   :  { %406 = vmatpush1.bf16.msra.mxu1 %v2179_v32  ;;  %651 = vmatpush1.bf16.msra.mxu0 %v2216_v58  ;;  %v2251_v32 = vld [vmem:[#allocation7 + $0x224] ss:$8 sps:$4 sm:$0xff]   ;;  %v222_v58 = vrot.slane %v213_v56, %v2678_v11 }
  0x77   :  { %407 = vmatprep.subr.bf16.mxu1 %v2180_v33  ;;  %652 = vmatprep.subr.bf16.mxu0 %v2221_v59  ;;  %v2249_v33 = vld [vmem:[#allocation7 + $0x220] ss:$8 sps:$4 sm:$0xff]   ;;  %v2335_v56 = vld [vmem:[#allocation7 + $0x3e4] ss:$8 sps:$4 sm:$0xff]  }
  0x7a   :  { %408 = vmatpush1.bf16.msra.mxu1 %v2182_v34  ;;  %653 = vmatpush1.bf16.msra.mxu0 %v2219_v60  ;;  %v2254_v34 = vld [vmem:[#allocation7 + $0x234] ss:$8 sps:$4 sm:$0xff]  }
  0x7b   :  { %409 = vmatprep.subr.bf16.mxu1 %v2183_v35  ;;  %654 = vmatprep.subr.bf16.mxu0 %v2224_v61  ;;  %v2252_v35 = vld [vmem:[#allocation7 + $0x230] ss:$8 sps:$4 sm:$0xff]  }
  0x7e   :  { %410 = vmatpush1.bf16.msra.mxu1 %v2185_v36  ;;  %655 = vmatpush1.bf16.msra.mxu0 %v2222_v62  ;;  %v2257_v36 = vld [vmem:[#allocation7 + $0x244] ss:$8 sps:$4 sm:$0xff]  }
  0x7f   :  { %411 = vmatprep.subr.bf16.mxu1 %v2186_v37  ;;  %656 = vmatprep.subr.bf16.mxu0 %v2227_v63  ;;  %v2255_v37 = vld [vmem:[#allocation7 + $0x240] ss:$8 sps:$4 sm:$0xff]  }
  0x82   :  { %412 = vmatpush1.bf16.msra.mxu1 %v2188_v38  ;;  %657 = vmatpush1.bf16.msra.mxu0 %v2225_v0  ;;  %v2260_v38 = vld [vmem:[#allocation7 + $0x254] ss:$8 sps:$4 sm:$0xff]  }
  0x83   :  { %413 = vmatprep.subr.bf16.mxu1 %v2189_v39  ;;  %658 = vmatprep.subr.bf16.mxu0 %v2230_v1  ;;  %v2258_v39 = vld [vmem:[#allocation7 + $0x250] ss:$8 sps:$4 sm:$0xff]  }
  0x86   :  { %414 = vmatpush1.bf16.msra.mxu1 %v2191_v40  ;;  %659 = vmatpush1.bf16.msra.mxu0 %v2228_v2  ;;  %v2263_v40 = vld [vmem:[#allocation7 + $0x264] ss:$8 sps:$4 sm:$0xff]  }
  0x87   :  { %415 = vmatprep.subr.bf16.mxu1 %v2192_v41  ;;  %660 = vmatprep.subr.bf16.mxu0 %v2233_v3  ;;  %v2261_v41 = vld [vmem:[#allocation7 + $0x260] ss:$8 sps:$4 sm:$0xff]  }
  0x8a   :  { %416 = vmatpush1.bf16.msra.mxu1 %v2194_v42  ;;  %661 = vmatpush1.bf16.msra.mxu0 %v2231_v4  ;;  %v2266_v42 = vld [vmem:[#allocation7 + $0x274] ss:$8 sps:$4 sm:$0xff]  }
  0x8b   :  { %662 = vmatprep.subr.bf16.mxu0 %v2236_v5  ;;  %889 = vmatprep.subr.bf16.mxu1 %v2245_v29  ;;  %v2287_v5 = vld [vmem:[#allocation7 + $0x2e4] ss:$8 sps:$4 sm:$0xff]  }
  0x8c   :  { %v2317_v29 = vld [vmem:[#allocation7 + $0x384] ss:$8 sps:$4 sm:$0xff]  }
  0x8e   :  { %663 = vmatpush1.bf16.msra.mxu0 %v2234_v6  ;;  %v2285_v6 = vld [vmem:[#allocation7 + $0x2e0] ss:$8 sps:$4 sm:$0xff]  }
  0x8f   :  { %664 = vmatprep.subr.bf16.mxu0 %v2239_v24  ;;  %v2306_v24 = vld [vmem:[#allocation7 + $0x350] ss:$8 sps:$4 sm:$0xff]  }
  0x92   :  { %665 = vmatpush1.bf16.msra.mxu0 %v2237_v25  ;;  %v2311_v25 = vld [vmem:[#allocation7 + $0x364] ss:$8 sps:$4 sm:$0xff]  }
  0x93   :  { %666 = vmatprep.subr.bf16.mxu0 %v2242_v26  ;;  %v2309_v26 = vld [vmem:[#allocation7 + $0x360] ss:$8 sps:$4 sm:$0xff]  }
  0x96   :  { %667 = vmatpush1.bf16.msra.mxu0 %v2240_v27  ;;  %v2314_v27 = vld [vmem:[#allocation7 + $0x374] ss:$8 sps:$4 sm:$0xff]  }
 0x12a   :  { %v170_v14 = vpop.f32.mrb[0].mxu0 }
 0x12b   :  { %v171_v15 = vadd.f32 %v170_v14, %v93_v12  ;;  %v172_v16 = vpop.f32.mrb[1].mxu0  ;;  %v2293_v12 = vld [vmem:[#allocation7 + $0x304] ss:$8 sps:$4 sm:$0xff]   ;;  %v2294_v14 = vld [vmem:[#allocation7 + $0x310] ss:$8 sps:$4 sm:$0xff]  }
 0x12c   :  { %v173_v17 = vadd.f32 %v172_v16, %v97_v13  ;;  %v174_v18 = vpop.f32.mrb[2].mxu0  ;;  %v2296_v13 = vld [vmem:[#allocation7 + $0x314] ss:$8 sps:$4 sm:$0xff]   ;;  %1140 = vmatprep.subr.bf16.mxu0 %v2293_v12  ;;  %v2297_v16 = vld [vmem:[#allocation7 + $0x320] ss:$8 sps:$4 sm:$0xff]  }
 0x12d   :  { %v177_v19 = vmax.f32 %v171_v15, 0.0  ;;  %v175_v20 = vpop.f32.mrb[3].mxu0  ;;  %v2299_v15 = vld [vmem:[#allocation7 + $0x324] ss:$8 sps:$4 sm:$0xff]   ;;  %v2300_v18 = vld [vmem:[#allocation7 + $0x330] ss:$8 sps:$4 sm:$0xff]  }
 0x12e   :  { %v178_v21 = vmax.f32 %v173_v17, 0.0  ;;  %v2302_v17 = vld [vmem:[#allocation7 + $0x334] ss:$8 sps:$4 sm:$0xff]   ;;  %v2303_v20 = vld [vmem:[#allocation7 + $0x340] ss:$8 sps:$4 sm:$0xff]  }
 0x12f   :  { %v2684_v23 = vpack.c.bf16 %v177_v19, %v177_v19  ;;  %v2305_v19 = vld [vmem:[#allocation7 + $0x344] ss:$8 sps:$4 sm:$0xff]  }
 0x130   :  { %v2682_v22 = vpack.c.bf16 %v178_v21, %v178_v21  ;;  %v2308_v21 = vld [vmem:[#allocation7 + $0x354] ss:$8 sps:$4 sm:$0xff]   ;;  %v2365_v12 = vld [vmem:[#allocation7 + $0x484] ss:$8 sps:$4 sm:$0xff]  }
 0x132   :  { %417 = vmatprep.mubr.bf16.mxu1 %v2682_v22 }
 0x133   :  { %418 = vmatmul.mubr.bf16.vlgmr.msra.gmra.mrb[0].mxu1 %v2684_v23 }
 0x134   :  { %890 = vmatpush1.bf16.msra.mxu1 %v2243_v28  ;;  %v2312_v28 = vld [vmem:[#allocation7 + $0x370] ss:$8 sps:$4 sm:$0xff]  }
 0x135   :  { %891 = vmatprep.subr.bf16.mxu1 %v2248_v30  ;;  %v2315_v30 = vld [vmem:[#allocation7 + $0x380] ss:$8 sps:$4 sm:$0xff]  }
 0x138   :  { %892 = vmatpush1.bf16.msra.mxu1 %v2246_v31  ;;  %v2320_v31 = vld [vmem:[#allocation7 + $0x394] ss:$8 sps:$4 sm:$0xff]  }
 0x139   :  { %893 = vmatprep.subr.bf16.mxu1 %v2251_v32  ;;  %v2318_v32 = vld [vmem:[#allocation7 + $0x390] ss:$8 sps:$4 sm:$0xff]  }
 0x13c   :  { %894 = vmatpush1.bf16.msra.mxu1 %v2249_v33  ;;  %v2323_v33 = vld [vmem:[#allocation7 + $0x3a4] ss:$8 sps:$4 sm:$0xff]  }
 0x13d   :  { %895 = vmatprep.subr.bf16.mxu1 %v2254_v34  ;;  %v2321_v34 = vld [vmem:[#allocation7 + $0x3a0] ss:$8 sps:$4 sm:$0xff]  }
 0x140   :  { %896 = vmatpush1.bf16.msra.mxu1 %v2252_v35  ;;  %v2326_v35 = vld [vmem:[#allocation7 + $0x3b4] ss:$8 sps:$4 sm:$0xff]  }
 0x141   :  { %897 = vmatprep.subr.bf16.mxu1 %v2257_v36  ;;  %v2324_v36 = vld [vmem:[#allocation7 + $0x3b0] ss:$8 sps:$4 sm:$0xff]  }
 0x144   :  { %898 = vmatpush1.bf16.msra.mxu1 %v2255_v37  ;;  %v2329_v37 = vld [vmem:[#allocation7 + $0x3c4] ss:$8 sps:$4 sm:$0xff]  }
 0x145   :  { %899 = vmatprep.subr.bf16.mxu1 %v2260_v38  ;;  %v2327_v38 = vld [vmem:[#allocation7 + $0x3c0] ss:$8 sps:$4 sm:$0xff]  }
 0x148   :  { %900 = vmatpush1.bf16.msra.mxu1 %v2258_v39  ;;  %v2332_v39 = vld [vmem:[#allocation7 + $0x3d4] ss:$8 sps:$4 sm:$0xff]  }
 0x149   :  { %901 = vmatprep.subr.bf16.mxu1 %v2263_v40  ;;  %v2330_v40 = vld [vmem:[#allocation7 + $0x3d0] ss:$8 sps:$4 sm:$0xff]  }
 0x14c   :  { %902 = vmatpush1.bf16.msra.mxu1 %v2261_v41  ;;  %v1925_v41 = vld [vmem:[%s2755_s4 + $0x2] sm:$0x3] }
 0x14d   :  { %903 = vmatprep.subr.bf16.mxu1 %v2266_v42  ;;  %v469_v42 = vrot.slane %v1925_v41, %v2673_v9 }
 0x150   :  { %904 = vmatpush1.bf16.msra.mxu1 %v2264_v43  ;;  %v473_v43 = vrot.slane %v1925_v41, %v2678_v11  ;;  %v2386_v41 = vld [vmem:[#allocation7 + $0x4f4] ss:$8 sps:$4 sm:$0xff]  }
 0x151   :  { %905 = vmatprep.subr.bf16.mxu1 %v2269_v44 }
 0x154   :  { %906 = vmatpush1.bf16.msra.mxu1 %v2267_v45 }
 0x155   :  { %907 = vmatprep.subr.bf16.mxu1 %v2272_v46 }
 0x158   :  { %908 = vmatpush1.bf16.msra.mxu1 %v2270_v47 }
 0x159   :  { %909 = vmatprep.subr.bf16.mxu1 %v2275_v48 }
 0x15c   :  { %910 = vmatpush1.bf16.msra.mxu1 %v2273_v49 }
 0x15d   :  { %911 = vmatprep.subr.bf16.mxu1 %v2278_v50 }
 0x160   :  { %912 = vmatpush1.bf16.msra.mxu1 %v2276_v51 }
 0x161   :  { %913 = vmatprep.subr.bf16.mxu1 %v2281_v52 }
 0x164   :  { %914 = vmatpush1.bf16.msra.mxu1 %v2279_v53 }
 0x165   :  { %915 = vmatprep.subr.bf16.mxu1 %v2284_v54 }
 0x168   :  { %916 = vmatpush1.bf16.msra.mxu1 %v2282_v55 }
 0x169   :  { %917 = vmatprep.subr.bf16.mxu1 %v2287_v5  ;;  %v2354_v5 = vld [vmem:[#allocation7 + $0x450] ss:$8 sps:$4 sm:$0xff]  }
 0x16c   :  { %918 = vmatpush1.bf16.msra.mxu1 %v2285_v6  ;;  %v2359_v6 = vld [vmem:[#allocation7 + $0x464] ss:$8 sps:$4 sm:$0xff]  }
 0x16d   :  { %919 = vmatprep.subr.bf16.mxu1 %v2290_v7  ;;  %v2357_v7 = vld [vmem:[#allocation7 + $0x460] ss:$8 sps:$4 sm:$0xff]  }
 0x170   :  { %920 = vmatpush1.bf16.msra.mxu1 %v2288_v8  ;;  %v2362_v8 = vld [vmem:[#allocation7 + $0x474] ss:$8 sps:$4 sm:$0xff]  }
 0x206   :  { %v419_v59 = vpop.f32.mrb[0].mxu1 }
 0x207   :  { %v420_v60 = vadd.f32 %v419_v59, %v218_v57  ;;  %v421_v61 = vpop.f32.mrb[1].mxu1  ;;  %v2333_v57 = vld [vmem:[#allocation7 + $0x3e0] ss:$8 sps:$4 sm:$0xff]   ;;  %v2336_v59 = vld [vmem:[#allocation7 + $0x3f0] ss:$8 sps:$4 sm:$0xff]  }
 0x208   :  { %v422_v62 = vadd.f32 %v421_v61, %v222_v58  ;;  %v423_v63 = vpop.f32.mrb[2].mxu1  ;;  %v2338_v58 = vld [vmem:[#allocation7 + $0x3f4] ss:$8 sps:$4 sm:$0xff]   ;;  %v2341_v61 = vld [vmem:[#allocation7 + $0x404] ss:$8 sps:$4 sm:$0xff]  }
 0x209   :  { %v426_v0 = vmax.f32 %v420_v60, 0.0  ;;  %v424_v1 = vpop.f32.mrb[3].mxu1  ;;  %v2339_v60 = vld [vmem:[#allocation7 + $0x400] ss:$8 sps:$4 sm:$0xff]   ;;  %1393 = vmatprep.subr.bf16.mxu1 %v2341_v61  ;;  %v2413_v61 = vld [vmem:[#allocation7 + $0x584] ss:$8 sps:$4 sm:$0xff]  }
 0x20a   :  { %v427_v2 = vmax.f32 %v422_v62, 0.0  ;;  %v2344_v62 = vld [vmem:[#allocation7 + $0x414] ss:$8 sps:$4 sm:$0xff]   ;;  %v2345_v63 = vld [vmem:[#allocation7 + $0x420] ss:$8 sps:$4 sm:$0xff]  }
 0x20b   :  { %v428_v4 = vpack.c.bf16 %v426_v0, %v426_v0  ;;  %v2350_v0 = vld [vmem:[#allocation7 + $0x434] ss:$8 sps:$4 sm:$0xff]   ;;  %v2348_v1 = vld [vmem:[#allocation7 + $0x430] ss:$8 sps:$4 sm:$0xff]  }
 0x20c   :  { %v429_v3 = vpack.c.bf16 %v427_v2, %v427_v2  ;;  %v2353_v2 = vld [vmem:[#allocation7 + $0x444] ss:$8 sps:$4 sm:$0xff]  }
 0x20e   :  { %668 = vmatprep.mubr.bf16.mxu0 %v429_v3  ;;  %v2351_v3 = vld [vmem:[#allocation7 + $0x440] ss:$8 sps:$4 sm:$0xff]  }
 0x20f   :  { %669 = vmatmul.mubr.bf16.vlgmr.msra.gmra.mrb[4].mxu0 %v428_v4  ;;  %v2356_v4 = vld [vmem:[#allocation7 + $0x454] ss:$8 sps:$4 sm:$0xff]  }
 0x210   :  { %1141 = vmatpush1.bf16.msra.mxu0 %v2291_v10  ;;  %v2360_v10 = vld [vmem:[#allocation7 + $0x470] ss:$8 sps:$4 sm:$0xff]  }
 0x211   :  { %1142 = vmatprep.subr.bf16.mxu0 %v2296_v13  ;;  %v2363_v13 = vld [vmem:[#allocation7 + $0x480] ss:$8 sps:$4 sm:$0xff]  }
 0x214   :  { %1143 = vmatpush1.bf16.msra.mxu0 %v2294_v14  ;;  %v2368_v14 = vld [vmem:[#allocation7 + $0x494] ss:$8 sps:$4 sm:$0xff]  }
 0x215   :  { %1144 = vmatprep.subr.bf16.mxu0 %v2299_v15  ;;  %v2366_v15 = vld [vmem:[#allocation7 + $0x490] ss:$8 sps:$4 sm:$0xff]  }
 0x218   :  { %1145 = vmatpush1.bf16.msra.mxu0 %v2297_v16  ;;  %v2371_v16 = vld [vmem:[#allocation7 + $0x4a4] ss:$8 sps:$4 sm:$0xff]  }
 0x219   :  { %1146 = vmatprep.subr.bf16.mxu0 %v2302_v17  ;;  %v2369_v17 = vld [vmem:[#allocation7 + $0x4a0] ss:$8 sps:$4 sm:$0xff]  }
 0x21c   :  { %1147 = vmatpush1.bf16.msra.mxu0 %v2300_v18  ;;  %v2374_v18 = vld [vmem:[#allocation7 + $0x4b4] ss:$8 sps:$4 sm:$0xff]  }
 0x21d   :  { %1148 = vmatprep.subr.bf16.mxu0 %v2305_v19  ;;  %v2372_v19 = vld [vmem:[#allocation7 + $0x4b0] ss:$8 sps:$4 sm:$0xff]  }
 0x220   :  { %1149 = vmatpush1.bf16.msra.mxu0 %v2303_v20  ;;  %v2377_v20 = vld [vmem:[#allocation7 + $0x4c4] ss:$8 sps:$4 sm:$0xff]  }
 0x221   :  { %1150 = vmatprep.subr.bf16.mxu0 %v2308_v21  ;;  %v2375_v21 = vld [vmem:[#allocation7 + $0x4c0] ss:$8 sps:$4 sm:$0xff]  }
 0x224   :  { %1151 = vmatpush1.bf16.msra.mxu0 %v2306_v24  ;;  %v2380_v24 = vld [vmem:[#allocation7 + $0x4d4] ss:$8 sps:$4 sm:$0xff]  }
 0x225   :  { %1152 = vmatprep.subr.bf16.mxu0 %v2311_v25  ;;  %v2378_v25 = vld [vmem:[#allocation7 + $0x4d0] ss:$8 sps:$4 sm:$0xff]  }
 0x228   :  { %1153 = vmatpush1.bf16.msra.mxu0 %v2309_v26  ;;  %v1958_v26 = vld [vmem:[%s2755_s4 + $0x4] sm:$0x3] }
 0x229   :  { %1154 = vmatprep.subr.bf16.mxu0 %v2314_v27  ;;  %v722_v27 = vrot.slane %v1958_v26, %v2673_v9 }
 0x22c   :  { %1155 = vmatpush1.bf16.msra.mxu0 %v2312_v28  ;;  %v726_v28 = vrot.slane %v1958_v26, %v2678_v11  ;;  %v2431_v26 = vld [vmem:[#allocation7 + $0x5e4] ss:$8 sps:$4 sm:$0xff]  }
 0x22d   :  { %1156 = vmatprep.subr.bf16.mxu0 %v2317_v29 }
 0x230   :  { %1157 = vmatpush1.bf16.msra.mxu0 %v2315_v30 }
 0x231   :  { %1158 = vmatprep.subr.bf16.mxu0 %v2320_v31 }
 0x234   :  { %1159 = vmatpush1.bf16.msra.mxu0 %v2318_v32 }
 0x235   :  { %1160 = vmatprep.subr.bf16.mxu0 %v2323_v33 }
 0x238   :  { %1161 = vmatpush1.bf16.msra.mxu0 %v2321_v34 }
 0x239   :  { %1162 = vmatprep.subr.bf16.mxu0 %v2326_v35 }
 0x23c   :  { %1163 = vmatpush1.bf16.msra.mxu0 %v2324_v36 }
 0x23d   :  { %1164 = vmatprep.subr.bf16.mxu0 %v2329_v37 }
 0x240   :  { %1165 = vmatpush1.bf16.msra.mxu0 %v2327_v38 }
 0x241   :  { %1166 = vmatprep.subr.bf16.mxu0 %v2332_v39  ;;  %v2383_v39 = vld [vmem:[#allocation7 + $0x4e4] ss:$8 sps:$4 sm:$0xff]  }
 0x244   :  { %1167 = vmatpush1.bf16.msra.mxu0 %v2330_v40  ;;  %v2381_v40 = vld [vmem:[#allocation7 + $0x4e0] ss:$8 sps:$4 sm:$0xff]  }
 0x245   :  { %1168 = vmatprep.subr.bf16.mxu0 %v2335_v56  ;;  %v2402_v56 = vld [vmem:[#allocation7 + $0x550] ss:$8 sps:$4 sm:$0xff]  }
 0x248   :  { %1169 = vmatpush1.bf16.msra.mxu0 %v2333_v57  ;;  %v2407_v57 = vld [vmem:[#allocation7 + $0x564] ss:$8 sps:$4 sm:$0xff]  }
 0x249   :  { %1170 = vmatprep.subr.bf16.mxu0 %v2338_v58  ;;  %v2405_v58 = vld [vmem:[#allocation7 + $0x560] ss:$8 sps:$4 sm:$0xff]  }
 0x24c   :  { %1171 = vmatpush1.bf16.msra.mxu0 %v2336_v59  ;;  %v2410_v59 = vld [vmem:[#allocation7 + $0x574] ss:$8 sps:$4 sm:$0xff]  }
 0x2e2   :  { %v670_v44 = vpop.f32.mrb[4].mxu0 }
 0x2e3   :  { %v671_v45 = vadd.f32 %v670_v44, %v469_v42  ;;  %v672_v46 = vpop.f32.mrb[5].mxu0  ;;  %v2384_v42 = vld [vmem:[#allocation7 + $0x4f0] ss:$8 sps:$4 sm:$0xff]   ;;  %v2389_v44 = vld [vmem:[#allocation7 + $0x504] ss:$8 sps:$4 sm:$0xff]  }
 0x2e4   :  { %v673_v47 = vadd.f32 %v672_v46, %v473_v43  ;;  %v674_v48 = vpop.f32.mrb[6].mxu0  ;;  %v2387_v43 = vld [vmem:[#allocation7 + $0x500] ss:$8 sps:$4 sm:$0xff]   ;;  %1644 = vmatprep.subr.bf16.mxu0 %v2389_v44  ;;  %v2390_v46 = vld [vmem:[#allocation7 + $0x510] ss:$8 sps:$4 sm:$0xff]  }
 0x2e5   :  { %v677_v49 = vmax.f32 %v671_v45, 0.0  ;;  %v675_v50 = vpop.f32.mrb[7].mxu0  ;;  %v2392_v45 = vld [vmem:[#allocation7 + $0x514] ss:$8 sps:$4 sm:$0xff]   ;;  %v2393_v48 = vld [vmem:[#allocation7 + $0x520] ss:$8 sps:$4 sm:$0xff]  }
 0x2e6   :  { %v678_v51 = vmax.f32 %v673_v47, 0.0  ;;  %v2395_v47 = vld [vmem:[#allocation7 + $0x524] ss:$8 sps:$4 sm:$0xff]   ;;  %v2396_v50 = vld [vmem:[#allocation7 + $0x530] ss:$8 sps:$4 sm:$0xff]  }
 0x2e7   :  { %v679_v52 = vpack.c.bf16 %v677_v49, %v677_v49  ;;  %v2398_v49 = vld [vmem:[#allocation7 + $0x534] ss:$8 sps:$4 sm:$0xff]  }
 0x2e8   :  { %v680_v53 = vpack.c.bf16 %v678_v51, %v678_v51  ;;  %v2401_v51 = vld [vmem:[#allocation7 + $0x544] ss:$8 sps:$4 sm:$0xff]  }
 0x2e9   :  { %v2702_v55 = vadd.bf16 %v679_v52, %v2684_v23  ;;  %v2347_v23 = vld [vmem:[#allocation7 + $0x424] ss:$8 sps:$4 sm:$0xff]   ;;  %v2399_v52 = vld [vmem:[#allocation7 + $0x540] ss:$8 sps:$4 sm:$0xff]  }
 0x2ea   :  { %v2699_v54 = vadd.bf16 %v680_v53, %v2682_v22  ;;  %v2342_v22 = vld [vmem:[#allocation7 + $0x410] ss:$8 sps:$4 sm:$0xff]   ;;  %v2404_v53 = vld [vmem:[#allocation7 + $0x554] ss:$8 sps:$4 sm:$0xff]  }
 0x2ec   :  { %921 = vmatprep.mubr.bf16.mxu1 %v2699_v54 }
 0x2ed   :  { %922 = vmatmul.mubr.bf16.vlgmr.msra.gmra.mrb[4].mxu1 %v2702_v55 }
 0x2ee   :  { %1394 = vmatpush1.bf16.msra.mxu1 %v2339_v60  ;;  %v2408_v60 = vld [vmem:[#allocation7 + $0x570] ss:$8 sps:$4 sm:$0xff]  }
 0x2ef   :  { %1395 = vmatprep.subr.bf16.mxu1 %v2344_v62  ;;  %v2411_v62 = vld [vmem:[#allocation7 + $0x580] ss:$8 sps:$4 sm:$0xff]  }
 0x2f2   :  { %1396 = vmatpush1.bf16.msra.mxu1 %v2342_v22  ;;  %v2416_v22 = vld [vmem:[#allocation7 + $0x594] ss:$8 sps:$4 sm:$0xff]  }
 0x2f3   :  { %1397 = vmatprep.subr.bf16.mxu1 %v2347_v23  ;;  %v2414_v23 = vld [vmem:[#allocation7 + $0x590] ss:$8 sps:$4 sm:$0xff]  }
 0x2f6   :  { %1398 = vmatpush1.bf16.msra.mxu1 %v2345_v63  ;;  %v2419_v63 = vld [vmem:[#allocation7 + $0x5a4] ss:$8 sps:$4 sm:$0xff]  }
 0x2f7   :  { %1399 = vmatprep.subr.bf16.mxu1 %v2350_v0  ;;  %v2417_v0 = vld [vmem:[#allocation7 + $0x5a0] ss:$8 sps:$4 sm:$0xff]  }
 0x2fa   :  { %1400 = vmatpush1.bf16.msra.mxu1 %v2348_v1  ;;  %v2422_v1 = vld [vmem:[#allocation7 + $0x5b4] ss:$8 sps:$4 sm:$0xff]  }
 0x2fb   :  { %1401 = vmatprep.subr.bf16.mxu1 %v2353_v2  ;;  %v2420_v2 = vld [vmem:[#allocation7 + $0x5b0] ss:$8 sps:$4 sm:$0xff]  }
 0x2fe   :  { %1402 = vmatpush1.bf16.msra.mxu1 %v2351_v3  ;;  %v2425_v3 = vld [vmem:[#allocation7 + $0x5c4] ss:$8 sps:$4 sm:$0xff]  }
 0x2ff   :  { %1403 = vmatprep.subr.bf16.mxu1 %v2356_v4  ;;  %v2423_v4 = vld [vmem:[#allocation7 + $0x5c0] ss:$8 sps:$4 sm:$0xff]  }
 0x302   :  { %1404 = vmatpush1.bf16.msra.mxu1 %v2354_v5  ;;  %v2428_v5 = vld [vmem:[#allocation7 + $0x5d4] ss:$8 sps:$4 sm:$0xff]  }
 0x303   :  { %1405 = vmatprep.subr.bf16.mxu1 %v2359_v6  ;;  %v2426_v6 = vld [vmem:[#allocation7 + $0x5d0] ss:$8 sps:$4 sm:$0xff]  }
 0x306   :  { %1406 = vmatpush1.bf16.msra.mxu1 %v2357_v7  ;;  %v1991_v7 = vld [vmem:[%s2755_s4 + $0x6] sm:$0x3] }
 0x307   :  { %1407 = vmatprep.subr.bf16.mxu1 %v2362_v8  ;;  %v973_v8 = vrot.slane %v1991_v7, %v2673_v9 }
 0x30a   :  { %1408 = vmatpush1.bf16.msra.mxu1 %v2360_v10  ;;  %v977_v10 = vrot.slane %v1991_v7, %v2678_v11 }
 0x30b   :  { %1409 = vmatprep.subr.bf16.mxu1 %v2365_v12 }
 0x30e   :  { %1410 = vmatpush1.bf16.msra.mxu1 %v2363_v13 }
 0x30f   :  { %1411 = vmatprep.subr.bf16.mxu1 %v2368_v14 }
 0x312   :  { %1412 = vmatpush1.bf16.msra.mxu1 %v2366_v15 }
 0x313   :  { %1413 = vmatprep.subr.bf16.mxu1 %v2371_v16 }
 0x316   :  { %1414 = vmatpush1.bf16.msra.mxu1 %v2369_v17 }
 0x317   :  { %1415 = vmatprep.subr.bf16.mxu1 %v2374_v18 }
 0x31a   :  { %1416 = vmatpush1.bf16.msra.mxu1 %v2372_v19 }
 0x31b   :  { %1417 = vmatprep.subr.bf16.mxu1 %v2377_v20 }
 0x31e   :  { %1418 = vmatpush1.bf16.msra.mxu1 %v2375_v21 }
 0x31f   :  { %1419 = vmatprep.subr.bf16.mxu1 %v2380_v24 }
 0x322   :  { %1420 = vmatpush1.bf16.msra.mxu1 %v2378_v25 }
 0x323   :  { %1421 = vmatprep.subr.bf16.mxu1 %v2383_v39  ;;  %v2024_v39 = vld [vmem:[%s2755_s4 + $0x8] sm:$0x3] }
 0x326   :  { %1422 = vmatpush1.bf16.msra.mxu1 %v2381_v40  ;;  %v1226_v40 = vrot.slane %v2024_v39, %v2673_v9 }
 0x327   :  { %1423 = vmatprep.subr.bf16.mxu1 %v2386_v41  ;;  %v1230_v41 = vrot.slane %v2024_v39, %v2678_v11 }
 0x32a   :  { %1424 = vmatpush1.bf16.msra.mxu1 %v2384_v42 }
 0x3c0   :  { %v923_v29 = vpop.f32.mrb[4].mxu1 }
 0x3c1   :  { %v924_v30 = vadd.f32 %v923_v29, %v722_v27  ;;  %v925_v31 = vpop.f32.mrb[5].mxu1  ;;  %v2429_v27 = vld [vmem:[#allocation7 + $0x5e0] ss:$8 sps:$4 sm:$0xff]   ;;  %v2432_v29 = vld [vmem:[#allocation7 + $0x5f0] ss:$8 sps:$4 sm:$0xff]  }
 0x3c2   :  { %v926_v32 = vadd.f32 %v925_v31, %v726_v28  ;;  %v927_v33 = vpop.f32.mrb[6].mxu1  ;;  %v2434_v28 = vld [vmem:[#allocation7 + $0x5f4] ss:$8 sps:$4 sm:$0xff]   ;;  %v2436_v31 = vld [vmem:[#allocation8] sm:$0xff]  }
 0x3c3   :  { %v930_v34 = vmax.f32 %v924_v30, 0.0  ;;  %v928_v35 = vpop.f32.mrb[7].mxu1  ;;  %v2435_v30 = vld [vmem:[#allocation8 + $0x40] sm:$0xff]   ;;  %v2440_v33 = vld [vmem:[#allocation8 + $0x10] sm:$0xff]  }
 0x3c4   :  { %v931_v36 = vmax.f32 %v926_v32, 0.0  ;;  %v2437_v32 = vld [vmem:[#allocation8 + $0x48] sm:$0xff]   ;;  %2107 = vmatprep.subr.bf16.mxu1 %v2435_v30  ;;  %v2442_v35 = vld [vmem:[#allocation8 + $0x18] sm:$0xff]  }
 0x3c5   :  { %v932_v38 = vpack.c.bf16 %v930_v34, %v930_v34  ;;  %v2441_v34 = vld [vmem:[#allocation8 + $0x58] sm:$0xff]  }
 0x3c6   :  { %v933_v37 = vpack.c.bf16 %v931_v36, %v931_v36  ;;  %v2443_v36 = vld [vmem:[#allocation8 + $0x60] sm:$0xff]  }
 0x3c8   :  { %1172 = vmatprep.mubr.bf16.mxu0 %v933_v37  ;;  %v2444_v37 = vld [vmem:[#allocation8 + $0x20] sm:$0xff]  }
 0x3c9   :  { %1173 = vmatmul.mubr.bf16.vlgmr.msra.gmra.mrb[8].mxu0 %v932_v38  ;;  %v2445_v38 = vld [vmem:[#allocation8 + $0x68] sm:$0xff]  }
 0x3ca   :  { %1645 = vmatpush1.bf16.msra.mxu0 %v2387_v43 }
 0x3cb   :  { %1646 = vmatprep.subr.bf16.mxu0 %v2392_v45 }
 0x3ce   :  { %1647 = vmatpush1.bf16.msra.mxu0 %v2390_v46 }
 0x3cf   :  { %1648 = vmatprep.subr.bf16.mxu0 %v2395_v47 }
 0x3d2   :  { %1649 = vmatpush1.bf16.msra.mxu0 %v2393_v48 }
 0x3d3   :  { %1650 = vmatprep.subr.bf16.mxu0 %v2398_v49 }
 0x3d6   :  { %1651 = vmatpush1.bf16.msra.mxu0 %v2396_v50 }
 0x3d7   :  { %1652 = vmatprep.subr.bf16.mxu0 %v2401_v51 }
 0x3da   :  { %1653 = vmatpush1.bf16.msra.mxu0 %v2399_v52  ;;  %v2446_v52 = vld [vmem:[#allocation8 + $0x28] sm:$0xff]  }
 0x3db   :  { %1654 = vmatprep.subr.bf16.mxu0 %v2404_v53  ;;  %v2447_v53 = vld [vmem:[#allocation8 + $0x70] sm:$0xff]  }
 0x3de   :  { %1655 = vmatpush1.bf16.msra.mxu0 %v2402_v56  ;;  %v2448_v56 = vld [vmem:[#allocation8 + $0x30] sm:$0xff]  }
 0x3df   :  { %1656 = vmatprep.subr.bf16.mxu0 %v2407_v57  ;;  %v2449_v57 = vld [vmem:[#allocation8 + $0x78] sm:$0xff]  }
 0x3e2   :  { %1657 = vmatpush1.bf16.msra.mxu0 %v2405_v58  ;;  %v2450_v58 = vld [vmem:[#allocation8 + $0x38] sm:$0xff]  }
 0x3e3   :  { %1658 = vmatprep.subr.bf16.mxu0 %v2410_v59  ;;  %v2057_v59 = vld [vmem:[%s2755_s4 + $0xa] sm:$0x3] }
 0x3e6   :  { %1659 = vmatpush1.bf16.msra.mxu0 %v2408_v60  ;;  %v1477_v60 = vrot.slane %v2057_v59, %v2673_v9  ;;  %v2090_v9 = vld [vmem:[%s2757_s6] ss:$0 sm:$0xff] }
 0x3e7   :  { %1660 = vmatprep.subr.bf16.mxu0 %v2413_v61  ;;  %v1481_v61 = vrot.slane %v2057_v59, %v2678_v11 }
 0x3ea   :  { %1661 = vmatpush1.bf16.msra.mxu0 %v2411_v62 }
 0x3eb   :  { %1662 = vmatprep.subr.bf16.mxu0 %v2416_v22 }
 0x3ee   :  { %1663 = vmatpush1.bf16.msra.mxu0 %v2414_v23 }
 0x3ef   :  { %1664 = vmatprep.subr.bf16.mxu0 %v2419_v63 }
 0x3f2   :  { %1665 = vmatpush1.bf16.msra.mxu0 %v2417_v0 }
 0x3f3   :  { %1666 = vmatprep.subr.bf16.mxu0 %v2422_v1 }
 0x3f6   :  { %1667 = vmatpush1.bf16.msra.mxu0 %v2420_v2 }
 0x3f7   :  { %1668 = vmatprep.subr.bf16.mxu0 %v2425_v3 }
 0x3fa   :  { %1669 = vmatpush1.bf16.msra.mxu0 %v2423_v4 }
 0x3fb   :  { %1670 = vmatprep.subr.bf16.mxu0 %v2428_v5 }
 0x3fe   :  { %1671 = vmatpush1.bf16.msra.mxu0 %v2426_v6 }
 0x3ff   :  { %1672 = vmatprep.subr.bf16.mxu0 %v2431_v26 }
 0x402   :  { %1673 = vmatpush1.bf16.msra.mxu0 %v2429_v27 }
 0x403   :  { %1674 = vmatprep.subr.bf16.mxu0 %v2434_v28 }
 0x406   :  { %1675 = vmatpush1.bf16.msra.mxu0 %v2432_v29 }
 0x49c   :  { %v1174_v12 = vpop.f32.mrb[8].mxu0 }
 0x49d   :  { %v1175_v13 = vadd.f32 %v1174_v12, %v973_v8  ;;  %v1176_v14 = vpop.f32.mrb[9].mxu0 }
 0x49e   :  { %v1177_v15 = vadd.f32 %v1176_v14, %v977_v10  ;;  %v1178_v16 = vpop.f32.mrb[10].mxu0 }
 0x49f   :  { %v1181_v17 = vmax.f32 %v1175_v13, 0.0  ;;  %v1179_v18 = vpop.f32.mrb[11].mxu0 }
 0x4a0   :  { %v1182_v19 = vmax.f32 %v1177_v15, 0.0 }
 0x4a1   :  { %v1183_v20 = vpack.c.bf16 %v1181_v17, %v1181_v17 }
 0x4a2   :  { %v1184_v21 = vpack.c.bf16 %v1182_v19, %v1182_v19 }
 0x4a3   :  { %v2720_v25 = vadd.bf16 %v1183_v20, %v2702_v55  ;;  %v2439_v55 = vld [vmem:[#allocation8 + $0x50] sm:$0xff]  }
 0x4a4   :  { %v2717_v24 = vadd.bf16 %v1184_v21, %v2699_v54  ;;  %v2438_v54 = vld [vmem:[#allocation8 + $0x8] sm:$0xff]  }
 0x4a6   :  { %1425 = vmatprep.mubr.bf16.mxu1 %v2717_v24 }
 0x4a7   :  { %1426 = vmatmul.mubr.bf16.vlgmr.msra.gmra.mrb[8].mxu1 %v2720_v25 }
 0x4a8   :  { %2108 = vmatpush3.bf16.msra.mxu1 %v2436_v31 }
 0x4a9   :  { %2109 = vmatprep.subr.bf16.mxu1 %v2437_v32 }
 0x4ac   :  { %2110 = vmatpush3.bf16.msra.mxu1 %v2438_v54 }
 0x4ad   :  { %2111 = vmatprep.subr.bf16.mxu1 %v2439_v55 }
 0x4b0   :  { %2112 = vmatpush3.bf16.msra.mxu1 %v2440_v33 }
 0x4b1   :  { %2113 = vmatprep.subr.bf16.mxu1 %v2441_v34 }
 0x4b4   :  { %2114 = vmatpush3.bf16.msra.mxu1 %v2442_v35 }
 0x4b5   :  { %2115 = vmatprep.subr.bf16.mxu1 %v2443_v36 }
 0x4b8   :  { %2116 = vmatpush3.bf16.msra.mxu1 %v2444_v37 }
 0x4b9   :  { %2117 = vmatprep.subr.bf16.mxu1 %v2445_v38 }
 0x4bc   :  { %2118 = vmatpush3.bf16.msra.mxu1 %v2446_v52 }
 0x4bd   :  { %2119 = vmatprep.subr.bf16.mxu1 %v2447_v53 }
 0x4c0   :  { %2120 = vmatpush3.bf16.msra.mxu1 %v2448_v56 }
 0x4c1   :  { %2121 = vmatprep.subr.bf16.mxu1 %v2449_v57 }
 0x4c4   :  { %2122 = vmatpush3.bf16.msra.mxu1 %v2450_v58 }
 0x57a   :  { %v1427_v42 = vpop.f32.mrb[8].mxu1 }
 0x57b   :  { %v1428_v43 = vadd.f32 %v1427_v42, %v1226_v40  ;;  %v1429_v44 = vpop.f32.mrb[9].mxu1 }
 0x57c   :  { %v1430_v45 = vadd.f32 %v1429_v44, %v1230_v41  ;;  %v1431_v46 = vpop.f32.mrb[10].mxu1 }
 0x57d   :  { %v1434_v47 = vmax.f32 %v1428_v43, 0.0  ;;  %v1432_v48 = vpop.f32.mrb[11].mxu1 }
 0x57e   :  { %v1435_v49 = vmax.f32 %v1430_v45, 0.0 }
 0x57f   :  { %v1436_v51 = vpack.c.bf16 %v1434_v47, %v1434_v47 }
 0x580   :  { %v1437_v50 = vpack.c.bf16 %v1435_v49, %v1435_v49 }
 0x582   :  { %1676 = vmatprep.mubr.bf16.mxu0 %v1437_v50 }
 0x583   :  { %1677 = vmatmul.mubr.bf16.vlgmr.msra.gmra.mrb[12].mxu0 %v1436_v51 }
 0x656   :  { %v1678_v62 = vpop.f32.mrb[12].mxu0 }
 0x657   :  { %v1679_v22 = vadd.f32 %v1678_v62, %v1477_v60  ;;  %v1680_v23 = vpop.f32.mrb[13].mxu0 }
 0x658   :  { %v1681_v63 = vadd.f32 %v1680_v23, %v1481_v61  ;;  %v1682_v0 = vpop.f32.mrb[14].mxu0 }
 0x659   :  { %v1685_v1 = vmax.f32 %v1679_v22, 0.0  ;;  %v1683_v2 = vpop.f32.mrb[15].mxu0 }
 0x65a   :  { %v1686_v3 = vmax.f32 %v1681_v63, 0.0 }
 0x65b   :  { %v1687_v4 = vpack.c.bf16 %v1685_v1, %v1685_v1 }
 0x65c   :  { %v1688_v5 = vpack.c.bf16 %v1686_v3, %v1686_v3 }
 0x65d   :  { %v1689_v7 = vadd.bf16 %v1687_v4, %v2720_v25 }
 0x65e   :  { %v1690_v6 = vadd.bf16 %v1688_v5, %v2717_v24 }
 0x660   :  { %1858 = vmatprep.mubr.bf16.mxu1 %v1690_v6 }
 0x661   :  { %1859 = vmatmul.mubr.bf16.vlgmr.msra.gmra.mrb[12].mxu1 %v1689_v7 }
 0x734   :  { %v2123_v8 = vpop.f32.mrb[12].mxu1 }
 0x735   :  { %v2124_v11 = vpop.f32.mrb[13].mxu1 }
 0x736   :  { %v2125_v10 = vadd.f32 %v2124_v11, %v2123_v8  ;;  %v2126_v12 = vpop.f32.mrb[14].mxu1 }
 0x737   :  { %v2127_v13 = vpop.f32.mrb[15].mxu1 }
 0x738   :  { %v1861_v14 = vadd.f32 %v2125_v10, %v2090_v9 }
 0x73a   :  { %v1866_v15 = vpack.c.bf16 %v1861_v14, %v1861_v14 }
 0x73c   :  { %1867 = vst [vmem:[#allocation10] sm:$0xf] %v1866_v15 }
 0x73d   :  { %2550 = shalt.err (!%p2547_p8)
}
 0x73e   :  { %s2551_s6 = scalar_lea.hbm %s2758_s7, 64 }
 0x73f   :  { %p2552_p9 = scmp.ne.s32.totalorder %s2758_s7, %s2551_s6  ;;  %p2555_p10 = scmp.lt.u32.totalorder %s2551_s6, %s2758_s7 }
 0x741   :  { %p2557_p11 = pnand %p2555_p10, %p2552_p9 }
 0x743   :  { %2560 = shalt.err (!%p2557_p11)
}
 0x744   :  { %1877 = dma.vmem_to_hbm [thread:$0]  %s1875_s19, 64, %s2758_s7, [#allocation4]  }
 0x745   :  { %2567 = dma.done.wait [#allocation4], 64  }
 0x746   :  { %2568 = vsyncadd [#allocation4], 4294967232 }
 0x747   :  { %1881 = vsyncpa [#allocation3], 1 }
 0x748   :  { %1882 = vsyncpa [#allocation6], 1 }
 0x749   :  { %1883 = vsyncpa [#allocation9], 1 }
 0x74a   :  { %1884 = vsyncpa [#allocation4], 1 }

</bundles_post_ra>
